<compile_context>
chip_gen: v7x
topology: tpu7x:2x2x1
jax: 0.10.0
libtpu: 0.0.40
codegen_flags: <defaults>
</compile_context>

<pallas_src>
import math
import functools

import jax
import jax.numpy as jnp
from jax import lax
from jax.experimental import pallas as pl
from jax.experimental.pallas import tpu as pltpu


def attention_kernel(x_ref, wq_ref, wk_ref, wv_ref, bqkv_ref,
                     attn_ref, ctx_ref, k_sc, v_sc, *, tq):
    """One (batch b, head h, query-tile qi) grid step.

    x_ref:    (1, S, E)      bf16  full sequence for this batch element
    wq_ref:   (1, E, hd)     bf16  per-head Q weights (scale folded in)
    wk_ref:   (1, E, hd)     bf16
    wv_ref:   (1, E, hd)     bf16
    bqkv_ref: (1, 3, hd)     f32   [bq (scaled) | bk | bv] for this head
    attn_ref: (1, 1, tq, S)  f32   attention probabilities
    ctx_ref:  (1, 1, tq, hd) bf16  per-head context (pre out-projection)
    k_sc:     (S, hd)        bf16  VMEM scratch, persists across qi steps
    v_sc:     (S, hd)        bf16
    """
    qi = pl.program_id(2)
    b_all = bqkv_ref[0]                                       # (3, hd) f32

    # K/V projection for this (b, h): computed once per head (qi == 0) into
    # VMEM scratch and reused by every query tile.
    @pl.when(qi == 0)
    def _():
        x_full = x_ref[0]                                     # (S, E) bf16
        k = jnp.dot(x_full, wk_ref[0],
                    preferred_element_type=jnp.float32) + b_all[1:2, :]
        v = jnp.dot(x_full, wv_ref[0],
                    preferred_element_type=jnp.float32) + b_all[2:3, :]
        k_sc[...] = k.astype(jnp.bfloat16)
        v_sc[...] = v.astype(jnp.bfloat16)

    # Q projection for this query tile only (no redundancy across the grid).
    q_start = pl.multiple_of(qi * tq, tq)
    x_q = x_ref[0, pl.ds(q_start, tq), :]                     # (tq, E) bf16
    q = jnp.dot(x_q, wq_ref[0],
                preferred_element_type=jnp.float32) + b_all[0:1, :]

    # q @ K^T without materializing a transpose: contract the last dims.
    logits = lax.dot_general(
        q.astype(jnp.bfloat16), k_sc[...],
        dimension_numbers=(((1,), (1,)), ((), ())),
        preferred_element_type=jnp.float32)                   # (tq, S)

    # Softmax in f32 (safe on all generations); exact normalization so the
    # exported attention rows sum to 1.
    m = jnp.max(logits, axis=-1, keepdims=True)
    e = jnp.exp(logits - m)
    denom = jnp.sum(e, axis=-1, keepdims=True)
    attn = e / denom                                          # (tq, S) f32
    attn_ref[0, 0] = attn

    # Per-head context (bf16 MXU, f32 acc); out-projection happens in a
    # separate fused GEMM kernel.
    ctx = jnp.dot(attn.astype(jnp.bfloat16), v_sc[...],
                  preferred_element_type=jnp.float32)         # (tq, hd)
    ctx_ref[0, 0] = ctx.astype(jnp.bfloat16)


def out_proj_kernel(ctx_ref, w_ref, b_ref, o_ref):
    """values = ctx @ Wout.T + bout, one row-tile per grid step."""
    o_ref[...] = (jnp.dot(ctx_ref[...], w_ref[...],
                          preferred_element_type=jnp.float32)
                  + b_ref[...]).astype(o_ref.dtype)


def multi_head_attention(x, wqkv, bqkv, wout, bout, num_head):
    B, S, E = x.shape
    H = num_head
    hd = E // H
    scale = 1.0 / math.sqrt(hd)

    # ---- one-time parameter preprocessing (hoisted out of the kernels) ----
    # nn.Linear applies x @ W.T + b; pre-transpose and de-interleave the
    # PyTorch head-interleaved [q0|k0|v0|q1|k1|v1|...] layout into per-head
    # slabs; fold the 1/sqrt(hd) scale into Wq / bq.
    wqkv_t = wqkv.T.reshape(E, H, 3, hd)                      # (E_in, H, {q,k,v}, hd)
    wq = jnp.transpose(wqkv_t[:, :, 0, :], (1, 0, 2)) * scale  # (H, E, hd)
    wk = jnp.transpose(wqkv_t[:, :, 1, :], (1, 0, 2))          # (H, E, hd)
    wv = jnp.transpose(wqkv_t[:, :, 2, :], (1, 0, 2))          # (H, E, hd)
    b3 = bqkv.reshape(H, 3, hd).astype(jnp.float32)
    b3 = b3.at[:, 0, :].multiply(scale)                        # scaled bq
    wout_t = wout.T.astype(jnp.bfloat16)                       # (E, E)
    bout2 = bout.reshape(1, E).astype(jnp.float32)

    # bf16 operands for the MXU; accumulation stays f32 inside the kernels.
    x_bf = x.astype(jnp.bfloat16)
    wq = wq.astype(jnp.bfloat16)
    wk = wk.astype(jnp.bfloat16)
    wv = wv.astype(jnp.bfloat16)

    # Query tile: big tiles amortize the per-step overhead and fill the MXU M dim.
    if S % 256 == 0:
        tq = 256
    elif S % 128 == 0:
        tq = 128
    else:
        tq = S                                                 # small / unaligned S
    n_q = S // tq

    kernel = functools.partial(attention_kernel, tq=tq)

    cost = pl.CostEstimate(
        flops=6 * B * S * E * E + 4 * B * S * S * E,
        transcendentals=B * H * S * S,
        bytes_accessed=(2 * B * S * E * 2          # x read + ctx write (bf16)
                        + B * 3 * E * E * 2        # weights streamed once per batch
                        + B * H * S * S * 4),      # attention probabilities write
    )

    grid_spec = pltpu.PrefetchScalarGridSpec(
        num_scalar_prefetch=0,
        grid=(B, H, n_q),                                      # qi innermost
        in_specs=[
            pl.BlockSpec((1, S, E), lambda b, h, qi: (b, 0, 0)),     # x (per batch)
            pl.BlockSpec((1, E, hd), lambda b, h, qi: (h, 0, 0)),    # wq (per head)
            pl.BlockSpec((1, E, hd), lambda b, h, qi: (h, 0, 0)),    # wk
            pl.BlockSpec((1, E, hd), lambda b, h, qi: (h, 0, 0)),    # wv
            pl.BlockSpec((1, 3, hd), lambda b, h, qi: (h, 0, 0)),    # merged biases
        ],
        out_specs=[
            pl.BlockSpec((1, 1, tq, S), lambda b, h, qi: (b, h, qi, 0)),   # attention
            pl.BlockSpec((1, 1, tq, hd), lambda b, h, qi: (b, h, qi, 0)),  # context
        ],
        scratch_shapes=[pltpu.VMEM((S, hd), jnp.bfloat16),     # K for this (b, h)
                        pltpu.VMEM((S, hd), jnp.bfloat16)],    # V for this (b, h)
    )

    attention, ctx = pl.pallas_call(
        kernel,
        out_shape=(jax.ShapeDtypeStruct((B, H, S, S), jnp.float32),
                   jax.ShapeDtypeStruct((B, H, S, hd), jnp.bfloat16)),
        grid_spec=grid_spec,
        compiler_params=pltpu.CompilerParams(
            dimension_semantics=("parallel", "parallel", "arbitrary"),
            vmem_limit_bytes=56 * 1024 * 1024),
        cost_estimate=cost,
    )(x_bf, wq, wk, wv, b3)

    # ---- fused out-projection: one E-deep GEMM over all heads ----
    # Concatenate heads (head-major along E, matching the PyTorch reshape).
    ctx_2d = jnp.transpose(ctx, (0, 2, 1, 3)).reshape(B * S, E)

    M = B * S
    if M % 256 == 0:
        tm = 256
    elif M % 128 == 0:
        tm = 128
    else:
        tm = M
    n_m = M // tm

    values = pl.pallas_call(
        out_proj_kernel,
        out_shape=jax.ShapeDtypeStruct((M, E), jnp.float32),
        grid_spec=pltpu.PrefetchScalarGridSpec(
            num_scalar_prefetch=0,
            grid=(n_m,),
            in_specs=[
                pl.BlockSpec((tm, E), lambda i: (i, 0)),       # context rows
                pl.BlockSpec((E, E), lambda i: (0, 0)),        # Wout.T (resident)
                pl.BlockSpec((1, E), lambda i: (0, 0)),        # bout
            ],
            out_specs=pl.BlockSpec((tm, E), lambda i: (i, 0)),
        ),
        compiler_params=pltpu.CompilerParams(
            dimension_semantics=("parallel",),
            vmem_limit_bytes=56 * 1024 * 1024),
    )(ctx_2d, wout_t, bout2)

    return values.reshape(B, S, E), attention


def reference_mha(x, wqkv, bqkv, wout, bout, num_head):
    """Pure-JAX f32 reference mirroring the PyTorch forward (mask=None)."""
    B, S, E = x.shape
    hd = E // num_head
    qkv = x @ wqkv.T + bqkv                                    # (B, S, 3E)
    qkv = qkv.reshape(B, S, num_head, 3 * hd).transpose(0, 2, 1, 3)
    q, k, v = jnp.split(qkv, 3, axis=-1)
    logits = jnp.einsum('bhqd,bhkd->bhqk', q, k) / math.sqrt(hd)
    attn = jax.nn.softmax(logits, axis=-1)
    vals = jnp.einsum('bhqk,bhkd->bhqd', attn, v)
    vals = vals.transpose(0, 2, 1, 3).reshape(B, S, E)
    out = vals @ wout.T + bout
    return out, attn


if __name__ == "__main__":
    B, S, E, H = 2, 8, 32, 4

    key = jax.random.PRNGKey(0)
    kx, k1, k2, k3, k4 = jax.random.split(key, 5)

    x = jax.random.normal(kx, (B, S, E), dtype=jnp.float32)

    # nn.Linear-style deterministic init (uniform in +/- 1/sqrt(fan_in))
    bound = 1.0 / math.sqrt(E)
    wqkv = jax.random.uniform(k1, (3 * E, E), jnp.float32, -bound, bound)
    bqkv = jax.random.uniform(k2, (3 * E,), jnp.float32, -bound, bound)
    wout = jax.random.uniform(k3, (E, E), jnp.float32, -bound, bound)
    bout = jax.random.uniform(k4, (E,), jnp.float32, -bound, bound)

    values, attention = multi_head_attention(x, wqkv, bqkv, wout, bout, H)
    values = jax.block_until_ready(values)
    attention = jax.block_until_ready(attention)

    ref_vals, ref_attn = reference_mha(x, wqkv, bqkv, wout, bout, H)
    assert values.shape == (B, S, E)
    assert attention.shape == (B, H, S, S)
    # bf16 MXU operands (f32 accumulation) => tolerances loosened vs pure-f32.
    assert jnp.allclose(values, ref_vals, atol=3e-2, rtol=3e-2)
    assert jnp.allclose(attention, ref_attn, atol=2e-2, rtol=2e-2)

    print("KERNEL_OK")
</pallas_src>

<mosaic_0001>
module attributes {stable_mosaic.version = 11 : i64} {
  func.func @attention_kernel(%arg0: i32, %arg1: i32, %arg2: i32, %arg3: memref<1x8x32xbf16, #tpu.memory_space<vmem>>, %arg4: memref<1x32x8xbf16, #tpu.memory_space<vmem>>, %arg5: memref<1x32x8xbf16, #tpu.memory_space<vmem>>, %arg6: memref<1x32x8xbf16, #tpu.memory_space<vmem>>, %arg7: memref<1x3x8xf32, #tpu.memory_space<vmem>>, %arg8: memref<1x1x8x8xf32, #tpu.memory_space<vmem>>, %arg9: memref<1x1x8x8xbf16, #tpu.memory_space<vmem>>, %arg10: memref<8x8xbf16, #tpu.memory_space<vmem>>, %arg11: memref<8x8xbf16, #tpu.memory_space<vmem>>) attributes {dimension_semantics = [#tpu.dimension_semantics<parallel>, #tpu.dimension_semantics<parallel>, #tpu.dimension_semantics<arbitrary>], iteration_bounds = array<i64: 2, 4, 1>, scalar_prefetch = 0 : i64, scratch_operands = 2 : i64, tpu.core_type = #tpu.core_type<tc>, window_params = [{transform_indices = @transform_0, window_bounds = array<i64: 1, 8, 32>}, {transform_indices = @transform_1, window_bounds = array<i64: 1, 32, 8>}, {transform_indices = @transform_2, window_bounds = array<i64: 1, 32, 8>}, {transform_indices = @transform_3, window_bounds = array<i64: 1, 32, 8>}, {transform_indices = @transform_4, window_bounds = array<i64: 1, 3, 8>}, {transform_indices = @transform_5, window_bounds = array<i64: 1, 1, 8, 8>}, {transform_indices = @transform_6, window_bounds = array<i64: 1, 1, 8, 8>}]} {
    %c0 = arith.constant 0 : index
    %c0_0 = arith.constant 0 : index
    %c0_1 = arith.constant 0 : index
    %0 = vector.load %arg7[%c0, %c0_0, %c0_1] : memref<1x3x8xf32, #tpu.memory_space<vmem>>, vector<1x3x8xf32>
    %1 = vector.shape_cast %0 : vector<1x3x8xf32> to vector<3x8xf32>
    %c0_i32 = arith.constant 0 : i32
    %2 = arith.cmpi eq, %arg2, %c0_i32 : i32
    %3 = arith.extui %2 : i1 to i32
    %c0_i32_2 = arith.constant 0 : i32
    %4 = arith.cmpi ne, %3, %c0_i32_2 : i32
    scf.if %4 {
      %c0_24 = arith.constant 0 : index
      %c0_25 = arith.constant 0 : index
      %c0_26 = arith.constant 0 : index
      %38 = vector.load %arg3[%c0_24, %c0_25, %c0_26] : memref<1x8x32xbf16, #tpu.memory_space<vmem>>, vector<1x8x32xbf16>
      %39 = vector.shape_cast %38 : vector<1x8x32xbf16> to vector<8x32xbf16>
      %c0_27 = arith.constant 0 : index
      %c0_28 = arith.constant 0 : index
      %c0_29 = arith.constant 0 : index
      %40 = vector.load %arg5[%c0_27, %c0_28, %c0_29] : memref<1x32x8xbf16, #tpu.memory_space<vmem>>, vector<1x32x8xbf16>
      %41 = vector.shape_cast %40 : vector<1x32x8xbf16> to vector<32x8xbf16>
      %cst_30 = arith.constant dense<0.000000e+00> : vector<8x8xf32>
      %42 = tpu.matmul %39, %41, %cst_30 {dimension_numbers = #tpu.dot_dimension_numbers<[1], [0], [0], [1], [0, 0, 1, 1], [], []>} : vector<8x32xbf16>, vector<32x8xbf16>, vector<8x8xf32> -> vector<8x8xf32>
      %43 = vector.extract_strided_slice %1 {offsets = [1, 0], sizes = [1, 8], strides = [1, 1]} : vector<3x8xf32> to vector<1x8xf32>
      %44 = vector.broadcast %43 : vector<1x8xf32> to vector<8x8xf32>
      %45 = arith.addf %42, %44 : vector<8x8xf32>
      %c0_31 = arith.constant 0 : index
      %c0_32 = arith.constant 0 : index
      %c0_33 = arith.constant 0 : index
      %46 = vector.load %arg6[%c0_31, %c0_32, %c0_33] : memref<1x32x8xbf16, #tpu.memory_space<vmem>>, vector<1x32x8xbf16>
      %47 = vector.shape_cast %46 : vector<1x32x8xbf16> to vector<32x8xbf16>
      %cst_34 = arith.constant dense<0.000000e+00> : vector<8x8xf32>
      %48 = tpu.matmul %39, %47, %cst_34 {dimension_numbers = #tpu.dot_dimension_numbers<[1], [0], [0], [1], [0, 0, 1, 1], [], []>} : vector<8x32xbf16>, vector<32x8xbf16>, vector<8x8xf32> -> vector<8x8xf32>
      %49 = vector.extract_strided_slice %1 {offsets = [2, 0], sizes = [1, 8], strides = [1, 1]} : vector<3x8xf32> to vector<1x8xf32>
      %50 = vector.broadcast %49 : vector<1x8xf32> to vector<8x8xf32>
      %51 = arith.addf %48, %50 : vector<8x8xf32>
      %52 = arith.truncf %45 : vector<8x8xf32> to vector<8x8xbf16>
      %c0_35 = arith.constant 0 : index
      %c0_36 = arith.constant 0 : index
      %53 = vector.load %arg10[%c0_35, %c0_36] : memref<8x8xbf16, #tpu.memory_space<vmem>>, vector<8x8xbf16>
      tpu.vector_store %arg10[%c0_35, %c0_36], %52 {strides = array<i32>} : memref<8x8xbf16, #tpu.memory_space<vmem>>, vector<8x8xbf16>,
      %54 = arith.truncf %51 : vector<8x8xf32> to vector<8x8xbf16>
      %c0_37 = arith.constant 0 : index
      %c0_38 = arith.constant 0 : index
      %55 = vector.load %arg11[%c0_37, %c0_38] : memref<8x8xbf16, #tpu.memory_space<vmem>>, vector<8x8xbf16>
      tpu.vector_store %arg11[%c0_37, %c0_38], %54 {strides = array<i32>} : memref<8x8xbf16, #tpu.memory_space<vmem>>, vector<8x8xbf16>,
    } else {
    }
    %c8_i32 = arith.constant 8 : i32
    %5 = arith.muli %arg2, %c8_i32 : i32
    %6 = tpu.assume_multiple %5, 8 : i32
    %c0_3 = arith.constant 0 : index
    %7 = arith.index_cast %6 : i32 to index
    %c0_4 = arith.constant 0 : index
    %8 = vector.load %arg3[%c0_3, %7, %c0_4] : memref<1x8x32xbf16, #tpu.memory_space<vmem>>, vector<1x8x32xbf16>
    %9 = vector.shape_cast %8 : vector<1x8x32xbf16> to vector<8x32xbf16>
    %c0_5 = arith.constant 0 : index
    %c0_6 = arith.constant 0 : index
    %c0_7 = arith.constant 0 : index
    %10 = vector.load %arg4[%c0_5, %c0_6, %c0_7] : memref<1x32x8xbf16, #tpu.memory_space<vmem>>, vector<1x32x8xbf16>
    %11 = vector.shape_cast %10 : vector<1x32x8xbf16> to vector<32x8xbf16>
    %cst = arith.constant dense<0.000000e+00> : vector<8x8xf32>
    %12 = tpu.matmul %9, %11, %cst {dimension_numbers = #tpu.dot_dimension_numbers<[1], [0], [0], [1], [0, 0, 1, 1], [], []>} : vector<8x32xbf16>, vector<32x8xbf16>, vector<8x8xf32> -> vector<8x8xf32>
    %13 = vector.extract_strided_slice %1 {offsets = [0, 0], sizes = [1, 8], strides = [1, 1]} : vector<3x8xf32> to vector<1x8xf32>
    %14 = vector.broadcast %13 : vector<1x8xf32> to vector<8x8xf32>
    %15 = arith.addf %12, %14 : vector<8x8xf32>
    %16 = arith.truncf %15 : vector<8x8xf32> to vector<8x8xbf16>
    %c0_8 = arith.constant 0 : index
    %c0_9 = arith.constant 0 : index
    %17 = vector.load %arg10[%c0_8, %c0_9] : memref<8x8xbf16, #tpu.memory_space<vmem>>, vector<8x8xbf16>
    %cst_10 = arith.constant dense<0.000000e+00> : vector<8x8xf32>
    %18 = tpu.matmul %16, %17, %cst_10 {dimension_numbers = #tpu.dot_dimension_numbers<[1], [1], [0], [0], [0, 0, 1, 0], [], []>} : vector<8x8xbf16>, vector<8x8xbf16>, vector<8x8xf32> -> vector<8x8xf32>
    %cst_11 = arith.constant dense<0xFF800000> : vector<8xf32>
    %19 = vector.multi_reduction <maximumf>, %18, %cst_11 [1] : vector<8x8xf32> to vector<8xf32>
    %20 = vector.shape_cast %19 : vector<8xf32> to vector<8x1xf32>
    %21 = vector.broadcast %20 : vector<8x1xf32> to vector<8x8xf32>
    %22 = arith.subf %18, %21 : vector<8x8xf32>
    %23 = math.exp %22 : vector<8x8xf32>
    %cst_12 = arith.constant dense<0.000000e+00> : vector<8xf32>
    %24 = vector.multi_reduction <add>, %23, %cst_12 [1] : vector<8x8xf32> to vector<8xf32>
    %25 = vector.shape_cast %24 : vector<8xf32> to vector<8x1xf32>
    %26 = vector.broadcast %25 : vector<8x1xf32> to vector<8x8xf32>
    %27 = arith.divf %23, %26 : vector<8x8xf32>
    %c0_13 = arith.constant 0 : index
    %c0_14 = arith.constant 0 : index
    %c0_15 = arith.constant 0 : index
    %c0_16 = arith.constant 0 : index
    %28 = vector.load %arg8[%c0_13, %c0_14, %c0_15, %c0_16] : memref<1x1x8x8xf32, #tpu.memory_space<vmem>>, vector<1x1x8x8xf32>
    %29 = vector.shape_cast %28 : vector<1x1x8x8xf32> to vector<8x8xf32>
    %30 = vector.shape_cast %27 : vector<8x8xf32> to vector<1x1x8x8xf32>
    tpu.vector_store %arg8[%c0_13, %c0_14, %c0_15, %c0_16], %30 {strides = array<i32>} : memref<1x1x8x8xf32, #tpu.memory_space<vmem>>, vector<1x1x8x8xf32>,
    %31 = arith.truncf %27 : vector<8x8xf32> to vector<8x8xbf16>
    %c0_17 = arith.constant 0 : index
    %c0_18 = arith.constant 0 : index
    %32 = vector.load %arg11[%c0_17, %c0_18] : memref<8x8xbf16, #tpu.memory_space<vmem>>, vector<8x8xbf16>
    %cst_19 = arith.constant dense<0.000000e+00> : vector<8x8xf32>
    %33 = tpu.matmul %31, %32, %cst_19 {dimension_numbers = #tpu.dot_dimension_numbers<[1], [0], [0], [1], [0, 0, 1, 1], [], []>} : vector<8x8xbf16>, vector<8x8xbf16>, vector<8x8xf32> -> vector<8x8xf32>
    %34 = arith.truncf %33 : vector<8x8xf32> to vector<8x8xbf16>
    %c0_20 = arith.constant 0 : index
    %c0_21 = arith.constant 0 : index
    %c0_22 = arith.constant 0 : index
    %c0_23 = arith.constant 0 : index
    %35 = vector.load %arg9[%c0_20, %c0_21, %c0_22, %c0_23] : memref<1x1x8x8xbf16, #tpu.memory_space<vmem>>, vector<1x1x8x8xbf16>
    %36 = vector.shape_cast %35 : vector<1x1x8x8xbf16> to vector<8x8xbf16>
    %37 = vector.shape_cast %34 : vector<8x8xbf16> to vector<1x1x8x8xbf16>
    tpu.vector_store %arg9[%c0_20, %c0_21, %c0_22, %c0_23], %37 {strides = array<i32>} : memref<1x1x8x8xbf16, #tpu.memory_space<vmem>>, vector<1x1x8x8xbf16>,
    return
  }
  func.func @transform_0(%arg0: i32, %arg1: i32, %arg2: i32) -> (i32, i32, i32) {
    %c0_i32 = arith.constant 0 : i32
    %c0_i32_0 = arith.constant 0 : i32
    %c0_i32_1 = arith.constant 0 : i32
    return %arg0, %c0_i32, %c0_i32_0 : i32, i32, i32
  }
  func.func @transform_1(%arg0: i32, %arg1: i32, %arg2: i32) -> (i32, i32, i32) {
    %c0_i32 = arith.constant 0 : i32
    %c0_i32_0 = arith.constant 0 : i32
    %c0_i32_1 = arith.constant 0 : i32
    return %arg1, %c0_i32, %c0_i32_0 : i32, i32, i32
  }
  func.func @transform_2(%arg0: i32, %arg1: i32, %arg2: i32) -> (i32, i32, i32) {
    %c0_i32 = arith.constant 0 : i32
    %c0_i32_0 = arith.constant 0 : i32
    %c0_i32_1 = arith.constant 0 : i32
    return %arg1, %c0_i32, %c0_i32_0 : i32, i32, i32
  }
  func.func @transform_3(%arg0: i32, %arg1: i32, %arg2: i32) -> (i32, i32, i32) {
    %c0_i32 = arith.constant 0 : i32
    %c0_i32_0 = arith.constant 0 : i32
    %c0_i32_1 = arith.constant 0 : i32
    return %arg1, %c0_i32, %c0_i32_0 : i32, i32, i32
  }
  func.func @transform_4(%arg0: i32, %arg1: i32, %arg2: i32) -> (i32, i32, i32) {
    %c0_i32 = arith.constant 0 : i32
    %c0_i32_0 = arith.constant 0 : i32
    %c0_i32_1 = arith.constant 0 : i32
    return %arg1, %c0_i32, %c0_i32_0 : i32, i32, i32
  }
  func.func @transform_5(%arg0: i32, %arg1: i32, %arg2: i32) -> (i32, i32, i32, i32) {
    %c0_i32 = arith.constant 0 : i32
    %c0_i32_0 = arith.constant 0 : i32
    return %arg0, %arg1, %arg2, %c0_i32 : i32, i32, i32, i32
  }
  func.func @transform_6(%arg0: i32, %arg1: i32, %arg2: i32) -> (i32, i32, i32, i32) {
    %c0_i32 = arith.constant 0 : i32
    %c0_i32_0 = arith.constant 0 : i32
    return %arg0, %arg1, %arg2, %c0_i32 : i32, i32, i32, i32
  }
}

</mosaic_0001>

<bundles_post_ra>
// kernel: tpu_custom_call.1
= control target key start
LH: loop header
LB: loop body
LE: loop exit
PB: predicated region body
PF: predicated region fallthrough
CT: control target
= control target key end

     0   :  { %12 = vsyncpa [#allocation5], 0  ;;  %s1423_s0 = inlined_call_operand.vmem [shape: bf16[2,8,32], index: 0, kind: input, shape index: {}]   ;;  %s1424_s1 = inlined_call_operand.vmem [shape: bf16[4,32,8], index: 1, kind: input, shape index: {}]   ;;  %s1425_s2 = inlined_call_operand.vmem [shape: bf16[4,32,8], index: 2, kind: input, shape index: {}]   ;;  %s1426_s3 = inlined_call_operand.vmem [shape: bf16[4,32,8], index: 3, kind: input, shape index: {}]   ;;  %s1427_s4 = inlined_call_operand.vmem [shape: f32[4,3,8], index: 4, kind: input, shape index: {}]   ;;  %s1428_s5 = inlined_call_operand.hbm [shape: f32[2,4,8,8], index: 5, kind: output, shape index: {0}]   ;;  %s1429_s6 = inlined_call_operand.hbm [shape: bf16[2,4,8,8], index: 6, kind: output, shape index: {1}]  }
   0x1   :  { %14 = vsyncpa [#allocation5 + $0x1], 0 }
   0x2   :  { %15 = vsyncpa [#allocation7], 0 }
   0x3   :  { %17 = vsyncpa [#allocation7 + $0x1], 0  ;;  %s1221_s21 = smov 0   ;;  %s1223_s22 = smov 0  }
   0x4   :  { %s1225_s23 = smov 0   ;;  %s1227_s24 = smov 0  }
   0x5   :  { %s1229_s25 = smov 0   ;;  %s1231_s26 = smov 0  }
   0x6   :  { %s1233_s27 = smov 0   ;;  %s1235_s28 = smov 0  }
   0x7 LB: > { %s880_s29 = sadd.s32 4294967295, %s1180_s28   ;;  %s881_s30 = sadd.s32 4294967294, %s1180_s28   ;;  %s1180_s28 = sphi %s1235_s28, %s23_s28   ;;  %s1176_s27 = sphi %s1233_s27, %s1444_s27   ;;  %s1172_s26 = sphi %s1231_s26, %s1443_s26   ;;  %s1168_s25 = sphi %s1229_s25, %s1442_s25   ;;  %s1164_s24 = sphi %s1227_s24, %s1441_s24   ;;  %s1160_s23 = sphi %s1225_s23, %s1440_s23   ;;  %s1156_s22 = sphi %s1223_s22, %s1439_s22   ;;  %s1152_s21 = sphi %s1221_s21, %s1438_s21  }
   0x8   : > { %s38_s7 = sadd.s32 1, %s1172_s26  ;;  %s42_s8 = sadd.s32 1, %s1176_s27 }
   0x9   : > { %p40_p0 = scmp.ge.s32.totalorder %s38_s7, 4  ;;  %p193_p1 = scmp.ne.s32.totalorder %s1160_s23, %s1156_s22 }
   0xa   : > { %p194_p2 = scmp.eq.s32.totalorder %s880_s29, 7  ;;  %p199_p5 = scmp.ne.s32.totalorder %s1156_s22, %s1152_s21 }
   0xb   : > { %s1446_s7 = smov (%p40_p0, %s38_s7), 0  ;;  %s1448_s8 = smov (!%p40_p0, %s42_s8), %s1176_s27 }
   0xc   : > { %1432 = sst [smem:[#allocation10_spill]] %s1446_s7  ;;  %s177_s9 = ssub.s32 %s1172_s26, %s1446_s7 }
   0xd   : > { %p1272_p3 = por %p194_p2, %p193_p1  ;;  %p44_p4 = scmp.ge.s32.totalorder %s1448_s8, 2 }
   0xe   : > { %p200_p6 = scmp.eq.s32.totalorder %s881_s30, 7  ;;  %p884_p7 = scmp.ge.s32.totalorder %s1180_s28, 1 }
   0xf   : > { %s1450_s8 = smov (%p44_p4, %s1448_s8), 0  ;;  %p286_p9 = scmp.lt.s32.totalorder %s1180_s28, 9 }
  0x10   : > { %1434 = sst [smem:[#allocation11_spill]] %s1450_s8  ;;  %p1281_p8 = por %p200_p6, %p199_p5 }
  0x11   : > { %s176_s12 = ssub.s32 %s1176_s27, %s1450_s8  ;;  %s183_s13 = sadd.s32 1, %s1160_s23 }
  0x12   : > { %s178_s14 = sor.u32 %s177_s9, %s176_s12  ;;  %p287_p10 = pnand %p884_p7, %p286_p9 }
  0x13   : > { %p181_p11 = scmp.eq.s32.totalorder %s178_s14, 0  ;;  %p343_p12 = scmp.lt.s32.totalorder (!%p287_p10), %s1164_s24, 3  ;;  %v1182_v0 = vmov (!%p287_p10), 0.0   ;;  %vm1183_vm0 = vmmov (!%p287_p10), 0   ;;  %vm389_vm1 = vcmask (!%p287_p10), 261120   ;;  %v373_v9 = vlaneseq (!%p287_p10) }
  0x14   : > { %290 = sbr.rel (%p287_p10) target bundleno = 1027 (0x403), region = 40  ;;  %p339_p13 = scmp.lt.s32.totalorder (!%p287_p10), %s1168_s25, 1  ;;  %930 = vmatprep.subr.bf16.mxu0 (!%p287_p10), %v1182_v0  ;;  %934 = vmatprep.mubr.msk.bf16.mxu0 (!%p287_p10), %vm1183_vm0, %v1182_v0  ;;  %vm494_vm2 = vcmask (!%p287_p10), 60416   ;;  %vm570_vm3 = vcmask (!%p287_p10), 64512   ;;  %vm634_vm4 = vcmask (!%p287_p10), 1043456  }
  0x15   : > { %s1290_s15 = scalar_select %p181_p11, %s1160_s23, %s183_s13  }
  0x16   : > { %938 = vmatprep.subr.bf16.mxu1 (!%p287_p10), %v1182_v0  ;;  %942 = vmatprep.mubr.msk.bf16.mxu1 (!%p287_p10), %vm1183_vm0, %v1182_v0  ;;  %v374_v10 = vshrl.u32 (!%p287_p10), %v373_v9, 7  ;;  %s908_s12 = sshll.u32 (!%p287_p10), %s1168_s25, 2 }
  0x18   : > { %v375_v11 = vsub.s32 (!%p287_p10), 1, %v374_v10  ;;  %v510_v20 = vsub.s32 (!%p287_p10), 0, %v374_v10  ;;  %v439_v30 = vsub.s32 (!%p287_p10), 2, %v374_v10 }
  0x1b   : > { %s1296_s16 = scalar_select %p343_p12, %s1164_s24, 3 }
  0x1c   : > { %s340_s17 = scalar_select %p339_p13, %s1168_s25, 1 }
  0x1d   : > { %s914_s18 = sshll.u32 %s1296_s16, 4 }
  0x1e   : > { %s352_s29 = scalar_lea.vmem %s1425_s2, %s914_s18  ;;  %s887_s30 = sshll.u32 %s340_s17, 2 }
  0x1f   : > { %v1044_v1 = vld [vmem:[%s352_s29] sm:$0xff]   ;;  %s347_s13 = scalar_lea.vmem %s1424_s1, %s914_s18  ;;  %v1045_v2 = vld [vmem:[%s352_s29 + $0x8] sm:$0xff]   ;;  %s342_s7 = scalar_lea.vmem %s1423_s0, %s887_s30 }
  0x20   : > { %931 = vmatpush3.bf16.msra.mxu0 %v1044_v1  ;;  %v368_v3 = vld [vmem:[%s342_s7] sm:$0xf]  ;;  %v1047_v5 = vld [vmem:[%s347_s13 + $0x8] sm:$0xff]   ;;  %s357_s19 = scalar_lea.vmem %s1426_s3, %s914_s18 }
  0x21   : > { %932 = vmatprep.subr.bf16.mxu0 %v1182_v0  ;;  %v1046_v4 = vld [vmem:[%s347_s13] sm:$0xff]   ;;  %v1049_v8 = vld [vmem:[%s357_s19 + $0x8] sm:$0xff]   ;;  %s1337_s13 = sadd.s32 %s1164_s24, %s908_s12 }
  0x22   : > { %v503_v6 = vld [vmem:[%s342_s7] sm:$0xf]  ;;  %s894_s7 = sshll.u32 %s1296_s16, 2  ;;  %s1330_s16 = sand.u32 1, %s1156_s22  }
  0x23   : > { %v1048_v7 = vld [vmem:[%s357_s19] sm:$0xff]   ;;  %s361_s30 = scalar_lea.vmem %s1427_s4, %s894_s7  ;;  %s885_s18 = sshll.u32 %s1330_s16, 3 }
  0x24   : > { %933 = vmatpush3.bf16.msra.mxu0 %v1045_v2  ;;  %939 = vmatpush3.bf16.msra.mxu1 %v1048_v7  ;;  %v363_v12 = vld [vmem:[%s361_s30] sm:$0x7]  ;;  %s331_s9 = scalar_lea.vmem [#allocation4], %s885_s18  ;;  %s909_s14 = sshll.u32 %s1337_s13, 7 }
  0x25   : > { %946 = vmatprep.subr.bf16.mxu0 %v1182_v0  ;;  %940 = vmatprep.subr.bf16.mxu1 %v1182_v0  ;;  %v376_v13 = vrot.slane %v363_v12, %v375_v11  ;;  %v511_v22 = vrot.slane %v363_v12, %v510_v20  ;;  %v440_v31 = vrot.slane %v363_v12, %v439_v30  ;;  %s703_s8 = sshll.u32 %s331_s9, 4  ;;  %s1343_s7 = scalar_lea.hbm %s1428_s5, %s909_s14  ;;  %s704_s8 = int_to_ptr.vmem [resolvable:$true] %s703_s8 }
  0x26   : > { %s682_s20 = scalar_lea.sflag [#allocation5], %s1330_s16  ;;  %s1054_s29 = scalar_lea.vmem %s704_s8, 128 }
  0x27   : > { %935 = vmatmul.mubr.msk.bf16.vlgmr.msra.gmra.mrb[0].mxu0 %vm389_vm1, %v368_v3  ;;  %p1055_p0 = scmp.ne.s32.totalorder %s704_s8, %s1054_s29  ;;  %s1184_s30 = smov [#allocation4]  }
  0x28   : > { %947 = vmatpush3.bf16.msra.mxu0 %v1046_v4  ;;  %950 = vmatprep.mubr.msk.bf16.mxu0 %vm1183_vm0, %v1182_v0  ;;  %s1058_s18 = sshll.u32 %s1184_s30, 4  ;;  %s1059_s18 = int_to_ptr.vmem [resolvable:$false] %s1058_s18 }
  0x29   : > { %948 = vmatprep.subr.bf16.mxu0 %v1182_v0  ;;  %941 = vmatpush3.bf16.msra.mxu1 %v1049_v8  ;;  %p1056_p1 = pnand %p1055_p0, %p1272_p3  ;;  %s1060_s24 = scalar_lea.vmem %s1059_s18, 256 }
  0x2a   : > { %954 = vmatprep.subr.bf16.mxu1 %v1182_v0  ;;  %p1061_p4 = scmp.lt.s32.totalorder %s704_s8, %s1059_s18  ;;  %p1062_p5 = scmp.lt.s32.totalorder %s1060_s24, %s1054_s29 }
  0x2b   : > { %p1057_p2 = pneg %p1056_p1 }
  0x2c   : > { %949 = vmatpush3.bf16.msra.mxu0 %v1047_v5  ;;  %943 = vmatmul.mubr.msk.bf16.vlgmr.msra.gmra.mrb[0].mxu1 %vm389_vm1, %v368_v3  ;;  %p1063_p6 = por %p1062_p5, %p1061_p4 }
  0x2d   : > { %960 = vmatprep.subr.bf16.mxu0 %v1182_v0  ;;  %956 = vmatprep.mubr.msk.bf16.mxu1 %vm1183_vm0, %v1182_v0 }
  0x2e   : > { %p1064_p7 = pnand %p1063_p6, %p1057_p2 }
  0x2f   : > { %951 = vmatmul.mubr.msk.bf16.vlgmr.msra.gmra.mrb[4].mxu0 %vm389_vm1, %v503_v6 }
  0x30   : > { %962 = vmatprep.mubr.msk.bf16.mxu0 %vm1183_vm0, %v1182_v0 }
  0xfa   : > { %v427_v14 = vpop.f32.mrb[0].mxu0 }
  0xfb   : > { %v428_v15 = vadd.f32 %v427_v14, %v376_v13  ;;  %v936_v16 = vpop.f32.mrb[1].mxu0 }
  0xfc   : > { %v430_v17 = vpop.f32.mrb[2].mxu0 }
  0xfd   : > { %v493_v18 = vpack.c.bf16 %v428_v15, %v428_v15  ;;  %v937_v19 = vpop.f32.mrb[3].mxu0 }
  0xff   : > { %495 = vst.msk [vmem:[#allocation2] sm:$0xf] %vm494_vm2, %v493_v18  ;;  %v487_v32 = vpop.f32.mrb[0].mxu1 }
 0x100   : > { %v488_v33 = vadd.f32 %v487_v32, %v440_v31  ;;  %v944_v34 = vpop.f32.mrb[1].mxu1 }
 0x101   : > { %v490_v35 = vpop.f32.mrb[2].mxu1 }
 0x102   : > { %v562_v21 = vpop.f32.mrb[4].mxu0  ;;  %v496_v36 = vpack.c.bf16 %v488_v33, %v488_v33  ;;  %v945_v37 = vpop.f32.mrb[3].mxu1 }
 0x103   : > { %v952_v23 = vpop.f32.mrb[5].mxu0  ;;  %v563_v27 = vadd.f32 %v562_v21, %v511_v22 }
 0x104   : > { %v565_v24 = vpop.f32.mrb[6].mxu0  ;;  %497 = vst.msk [vmem:[#allocation3] sm:$0xf] %vm494_vm2, %v496_v36 }
 0x105   : > { %v953_v25 = vpop.f32.mrb[7].mxu0  ;;  %v568_v29 = vpack.c.bf16 %v563_v27, %v563_v27 }
 0x106   : > { %v569_v26 = vld [vmem:[#allocation2] sm:$0xf] }
 0x107   : > { %v575_v28 = vsel %vm570_vm3, %v569_v26, 0 }
 0x108   : > { %955 = vmatpush3.bf16.xpose.msra.mxu1 %v575_v28 }
 0x10b   : > { %v630_v38 = vld [vmem:[#allocation3] sm:$0xf] }
 0x10c   : > { %v636_v39 = vsel %vm634_vm4, %v630_v38, 0 }
 0x10d   : > { %961 = vmatpush3.bf16.msra.mxu0 %v636_v39 }
 0x10f   : > { %957 = vmatmul.mubr.msk.bf16.vlgmr.msra.gmra.mrb[4].mxu1 %vm570_vm3, %v568_v29 }
 0x1e2   : > { %v611_v40 = vpop.f32.mrb[4].mxu1 }
 0x1e3   : > { %v958_v41 = vpop.f32.mrb[5].mxu1  ;;  %v617_v42 = vsel %vm570_vm3, %v611_v40, -inf }
 0x1e4   : > { %618 = vmax.xlane.f32.xlu0 %v617_v42  ;;  %v614_v43 = vpop.f32.mrb[6].mxu1 }
 0x1e5   : > { %v959_v44 = vpop.f32.mrb[7].mxu1 }
 0x271   : > { %v619_v45 = vpop.xlane.xlu0 %618 }
 0x272   : > { %v620_v46 = vsub.f32 %v611_v40, %v619_v45 }
 0x274   : > { %v621_v47 = vmul.f32 1.442695, %v620_v46 }
 0x276   : > { %1050 = vpow2.f32 %v621_v47 }
 0x280   : > { %v1051_v48 = vpop.eup %1050 }
 0x281   : > { %v623_v49 = vsel %vm570_vm3, %v1051_v48, 0.0 }
 0x282   : > { %624 = vadd.xlane.f32.xlu0 %v623_v49 }
 0x30f   : > { %v625_v50 = vpop.xlane.xlu0 %624 }
 0x310   : > { %1052 = vrcp.f32 %v625_v50 }
 0x31a   : > { %v1053_v51 = vpop.eup %1052 }
 0x31b   : > { %v627_v52 = vmul.f32 %v1053_v51, %v1051_v48 }
 0x31d   : > { %v629_v53 = vpack.c.bf16 %v627_v52, %v627_v52  ;;  %628 = vst.msk [vmem:[%s331_s9] sm:$0xff] %vm570_vm3, %v627_v52 }
 0x31f   : > { %963 = vmatmul.mubr.msk.bf16.vlgmr.msra.gmra.mrb[8].mxu0 %vm570_vm3, %v629_v53 }
 0x320   : > { %1067 = shalt.err (!%p1064_p7)
}
 0x321   : > { %s1068_s25 = scalar_lea.hbm %s1343_s7, 128  ;;  %s1072_s14 = scalar_lea.hbm %s1428_s5, 1024 }
 0x322   : > { %p1069_p9 = scmp.ne.s32.totalorder %s1343_s7, %s1068_s25  ;;  %p1073_p12 = scmp.lt.u32.totalorder %s1343_s7, %s1428_s5 }
 0x323   : > { %p1074_p13 = scmp.lt.u32.totalorder %s1072_s14, %s1068_s25  ;;  %p1076_p1 = scmp.lt.u32.totalorder %s1068_s25, %s1343_s7 }
 0x324   : > { %p1070_p10 = pnand %p1069_p9, %p1272_p3 }
 0x325   : > { %p1075_p0 = por %p1074_p13, %p1073_p12 }
 0x326   : > { %p1071_p11 = pneg %p1070_p10 }
 0x327   : > { %p1077_p2 = por %p1076_p1, %p1075_p0 }
 0x329   : > { %p1078_p4 = pnand %p1077_p2, %p1071_p11 }
 0x32b   : > { %1081 = shalt.err (!%p1078_p4)
}
 0x32c   : > { %966 = dma.vmem_to_hbm [thread:$0]  (%p1272_p3), %s704_s8, 128, %s1343_s7, %s682_s20  }
 0x32d   : > { %s886_s29 = sshll.u32 %s1330_s16, 2  ;;  %s911_s30 = sshll.u32 %s1337_s13, 6 }
 0x32e   : > { %s338_s18 = scalar_lea.vmem [#allocation6], %s886_s29  ;;  %s1368_s12 = scalar_lea.hbm %s1429_s6, %s911_s30 }
 0x32f   : > { %s719_s24 = sshll.u32 %s338_s18, 4  ;;  %s687_s13 = scalar_lea.sflag [#allocation7], %s1330_s16  ;;  %s1370_s24 = int_to_ptr.vmem [resolvable:$true] %s719_s24 }
 0x330   : > { %s1082_s8 = scalar_lea.vmem %s1370_s24, 64  ;;  %s1185_s7 = smov [#allocation6]  }
 0x331   : > { %p1083_p5 = scmp.ne.s32.totalorder %s1370_s24, %s1082_s8  ;;  %s1086_s20 = sshll.u32 %s1185_s7, 4  ;;  %s1087_s20 = int_to_ptr.vmem [resolvable:$false] %s1086_s20 }
 0x332   : > { %s1088_s14 = scalar_lea.vmem %s1087_s20, 128  ;;  %p1089_p9 = scmp.lt.s32.totalorder %s1370_s24, %s1087_s20 }
 0x333   : > { %p1084_p6 = pnand %p1083_p5, %p1272_p3  ;;  %p1090_p10 = scmp.lt.s32.totalorder %s1088_s14, %s1082_s8 }
 0x335   : > { %p1085_p7 = pneg %p1084_p6  ;;  %p1091_p11 = por %p1090_p10, %p1089_p9 }
 0x337   : > { %p1092_p12 = pnand %p1091_p11, %p1085_p7 }
 0x3f2   : > { %v672_v54 = vpop.f32.mrb[8].mxu0 }
 0x3f3   : > { %v678_v55 = vpack.c.bf16 %v672_v54, %v672_v54  ;;  %v964_v56 = vpop.f32.mrb[9].mxu0 }
 0x3f4   : > { %v675_v57 = vpop.f32.mrb[10].mxu0 }
 0x3f5   : > { %v965_v58 = vpop.f32.mrb[11].mxu0  ;;  %680 = vst.msk [vmem:[%s338_s18] sm:$0xf] %vm494_vm2, %v678_v55 }
 0x3f6   : > { %1095 = shalt.err (!%p1092_p12)
}
 0x3f7   : > { %s1096_s16 = scalar_lea.hbm %s1368_s12, 64  ;;  %s1100_s29 = scalar_lea.hbm %s1429_s6, 512 }
 0x3f8   : > { %p1097_p13 = scmp.ne.s32.totalorder %s1368_s12, %s1096_s16  ;;  %p1101_p2 = scmp.lt.u32.totalorder %s1368_s12, %s1429_s6 }
 0x3f9   : > { %p1102_p4 = scmp.lt.u32.totalorder %s1100_s29, %s1096_s16  ;;  %p1104_p6 = scmp.lt.u32.totalorder %s1096_s16, %s1368_s12 }
 0x3fa   : > { %p1098_p0 = pnand %p1097_p13, %p1272_p3 }
 0x3fb   : > { %p1103_p5 = por %p1102_p4, %p1101_p2 }
 0x3fc   : > { %p1099_p1 = pneg %p1098_p0 }
 0x3fd   : > { %p1105_p7 = por %p1104_p6, %p1103_p5 }
 0x3ff   : > { %p1106_p9 = pnand %p1105_p7, %p1099_p1 }
 0x401   : > { %1109 = shalt.err (!%p1106_p9)
}
 0x402   : > { %967 = dma.vmem_to_hbm [thread:$0]  (%p1272_p3), %s1370_s24, 64, %s1368_s12, %s687_s13  }
 0x403 PF: > { %p977_p10 = scmp.ge.s32.totalorder %s1180_s28, 2  ;;  %s731_s9 = sand.u32 1, %s1152_s21  }
 0x404   : > { %s732_s25 = scalar_lea.sflag [#allocation5], %s731_s9 }
 0x405   : > { %p971_p11 = pnand %p977_p10, %p1281_p8 }
 0x407   : > { %1143 = dma.done.wait (!%p971_p11), %s732_s25, 128  }
 0x408   : > { %1145 = vsyncadd (!%p971_p11), %s732_s25, 4294967168  ;;  %s741_s8 = scalar_lea.sflag [#allocation7], %s731_s9 }
 0x409   : > { %1147 = dma.done.wait (!%p971_p11), %s741_s8, 64  }
 0x40a   : > { %1149 = vsyncadd (!%p971_p11), %s741_s8, 4294967232  ;;  %s23_s28 = sadd.s32 1, %s1180_s28   ;;  %s1436_s10 = sld [smem:[#allocation10_spill]] }
 0x40b   : > { %p20_p12 = scmp.ge.s32.totalorder %s23_s28, 10   ;;  %s1437_s12 = sld [smem:[#allocation11_spill]] }
 0x40c   : > { %s1438_s21 = smov %s1156_s22  ;;  %s1439_s22 = smov %s1160_s23 }
 0x40d   : > { %s1440_s23 = smov %s1290_s15  ;;  %s1441_s24 = smov %s1172_s26 }
 0x40e   : > { %s1442_s25 = smov %s1176_s27  ;;  %22 = sbr.rel (!%p20_p12) target bundleno = 7 (0x7), region = 109 }
 0x410   : > { %s1443_s26 = smov %s1436_s10 }
 0x411   : > { %s1444_s27 = smov %s1437_s12 }
 0x415   :  { %746 = vsyncpa [#allocation5], 1 }
 0x416   :  { %748 = vsyncpa [#allocation5 + $0x1], 1 }
 0x417   :  { %749 = vsyncpa [#allocation7], 1 }
 0x418   :  { %751 = vsyncpa [#allocation7 + $0x1], 1 }

</bundles_post_ra>
